<compile_context>
chip_gen: v6e
topology: v6e:2x2x1
jax: 0.10.0
libtpu: 0.0.40
codegen_flags: <defaults>
</compile_context>

<pallas_src>
import jax
import jax.numpy as jnp
from jax.experimental import pallas as pl
from jax.experimental.pallas import tpu as pltpu


# Laplacian weights from the PyTorch module (used by the pure-JAX reference).
_LAP = (
    (1.0 / 8, 1.0 / 8, 1.0 / 8),
    (1.0 / 8, -1.0, 1.0 / 8),
    (1.0 / 8, 1.0 / 8, 1.0 / 8),
)

# Per-input-stream block budget (f32-equivalent bytes).  3 streams x 2 pipeline
# buffers x 2 MiB = 12 MiB of pipelined input VMEM, plus ~8-10 block-sized f32
# intermediates (~20 MiB) stays well under the 48 MiB scoped limit below and
# inside v7x's 64 MiB physical VMEM.
_BLOCK_BUDGET_BYTES = 2 * 1024 * 1024
_VMEM_LIMIT_BYTES = 48 * 1024 * 1024


def _f32(x):
    """Cast to f32 only if needed (keeps bf16 on the HBM wire, f32 math)."""
    return x if x.dtype == jnp.float32 else x.astype(jnp.float32)


def _laplacian_sq(x):
    """(3x3 laplacian valid conv)**2 on a (NB, H, W) tile, separable form.

    conv = (1/8) * box3x3 - (9/8) * center.
    Roll path (W % 128 == 0): returns (NB, H-2, W); columns 0 and W-1 are
      wrapped garbage and must be masked by the caller.
    Slice path (otherwise): returns the valid (NB, H-2, W-2) result directly.
    """
    NB, H, W = x.shape
    # Vertical 3-tap sum: lane-aligned, sublane-offset slices.
    rs = x[:, 0:H - 2, :] + x[:, 1:H - 1, :] + x[:, 2:H, :]        # (NB, H-2, W)
    if W % 128 == 0:
        # Lane-dense width: horizontal 3-tap via XLU lane rolls keeps every
        # intermediate full-width and vreg-aligned (no masked W-2 slabs).
        box = rs + pltpu.roll(rs, 1, axis=2) + pltpu.roll(rs, W - 1, axis=2)
        center = x[:, 1:H - 1, :]
    else:
        # Narrow / ragged width: fall back to valid-width lane slices.
        box = rs[:, :, 0:W - 2] + rs[:, :, 1:W - 1] + rs[:, :, 2:W]
        center = x[:, 1:H - 1, 1:W - 1]
    conv = box * jnp.float32(0.125) - center * jnp.float32(1.125)
    return conv * conv


def _content_loss_kernel(ir_ref, vi_ref, fu_ref, out_ref):
    """Per-block partial sums, written as lane vectors (no cross-lane reduce).

    out_ref block (1, 3, W):
      row 0: per-lane sum |fusion_grad - max_grad|  (texture / grad L1 numerator)
      row 1: per-lane sum (fusion - ir)^2           (MSE numerator)
      row 2: per-lane sum |fusion - vi|             (L1 numerator)
    """
    ir = _f32(ir_ref[...])
    vi = _f32(vi_ref[...])
    fu = _f32(fu_ref[...])
    NB, H, W = ir.shape

    ir_g = _laplacian_sq(ir)
    vi_g = _laplacian_sq(vi)
    fu_g = _laplacian_sq(fu)

    # torch: round((vi_g + ir_g) // (|vi_g + ir_g| + 1e-10)) * max(|vi_g|, |ir_g|)
    # round(floor(x)) == floor(x), so the round is dropped; the divide form is
    # kept as-is for exact parity with the torch f32 semantics.
    s = vi_g + ir_g
    sign = jnp.floor(s / (jnp.abs(s) + jnp.float32(1e-10)))
    max_g = sign * jnp.maximum(jnp.abs(vi_g), jnp.abs(ir_g))

    grad_term = jnp.abs(fu_g - max_g)
    Wg = grad_term.shape[-1]
    if Wg == W:
        # Roll path: zero the wrapped border columns before reducing.
        col = jax.lax.broadcasted_iota(jnp.int32, (1, 1, W), 2)
        col_ok = jnp.logical_and(col >= 1, col <= W - 2)
        grad_term = jnp.where(col_ok, grad_term, jnp.float32(0.0))

    d_fi = fu - ir

    # Partial sums over (batch, rows) only -> lane vectors.  These are VPU adds
    # plus a cheap intra-vreg sublane reduce; the expensive cross-lane reduce
    # happens once, in the wrapper, over a tiny (steps, 3, W) array.
    out_ref[0:1, 0:1, 0:Wg] = jnp.sum(grad_term, axis=(0, 1), keepdims=True)
    if Wg != W:  # slice path leaves 2 tail lanes unwritten -> zero them
        out_ref[0:1, 0:1, Wg:W] = jnp.zeros((1, 1, W - Wg), jnp.float32)
    out_ref[0:1, 1:2, :] = jnp.sum(d_fi * d_fi, axis=(0, 1), keepdims=True)
    out_ref[0:1, 2:3, :] = jnp.sum(jnp.abs(fu - vi), axis=(0, 1), keepdims=True)


@jax.jit
def g_content_loss(img_ir, img_vi, img_fusion):
    """Forward pass of the PyTorch g_content_loss module.

    Inputs: NCHW tensors with C == 1 (the gradient module uses channels=1).
    Returns: (content_loss, intensity_loss, texture_loss) scalars.
    """
    N, C, H, W = img_ir.shape
    assert C == 1, "gradient() is constructed with channels=1"
    assert H >= 3 and W >= 3, "3x3 valid conv needs H, W >= 3"

    # Keep native dtype on the HBM wire (no wrapper upcast).
    ir = img_ir.reshape(N, H, W)
    vi = img_vi.reshape(N, H, W)
    fu = img_fusion.reshape(N, H, W)

    # Images per grid step: as many as fit the f32-equivalent block budget.
    per_img_f32 = H * W * 4
    nb = int(max(1, min(N, _BLOCK_BUDGET_BYTES // per_img_f32)))
    n_steps = -(-N // nb)          # cdiv
    n_pad = n_steps * nb
    if n_pad != N:
        # Zero padding contributes exactly 0 to every partial sum.
        pad = ((0, n_pad - N), (0, 0), (0, 0))
        ir = jnp.pad(ir, pad)
        vi = jnp.pad(vi, pad)
        fu = jnp.pad(fu, pad)

    img_spec = pl.BlockSpec((nb, H, W), lambda i: (i, 0, 0))
    out_spec = pl.BlockSpec((1, 3, W), lambda i: (i, 0, 0))

    itemsize = jnp.dtype(img_ir.dtype).itemsize
    cost = pl.CostEstimate(
        flops=int(40 * n_pad * H * W),
        transcendentals=0,
        bytes_accessed=int(3 * n_pad * H * W * itemsize + n_steps * 3 * W * 4),
    )

    partials = pl.pallas_call(
        _content_loss_kernel,
        out_shape=jax.ShapeDtypeStruct((n_steps, 3, W), jnp.float32),
        grid=(n_steps,),
        in_specs=[img_spec, img_spec, img_spec],
        out_specs=out_spec,
        compiler_params=pltpu.CompilerParams(
            # Steps are independent (each writes its own output block), so the
            # axis can be sharded across both TensorCores on v7x.
            dimension_semantics=("parallel",),
            vmem_limit_bytes=_VMEM_LIMIT_BYTES,
        ),
        cost_estimate=cost,
    )(ir, vi, fu)

    sums = jnp.sum(partials, axis=(0, 2))          # (3,) final tiny reduce

    n_grad = jnp.float32(N * C * (H - 2) * (W - 2))
    n_full = jnp.float32(N * C * H * W)

    grad_loss = sums[0] / n_grad                   # L1 mean over grad maps
    mse_loss = sums[1] / n_full                    # MSE mean
    l1_loss = sums[2] / n_full                     # L1 mean

    lambda_2 = jnp.float32(1.0)
    lambda_3 = jnp.float32(10.0)

    intensity_loss = mse_loss + lambda_2 * l1_loss
    texture_loss = grad_loss
    content_loss = intensity_loss + lambda_3 * texture_loss
    return content_loss, intensity_loss, texture_loss


def _reference(img_ir, img_vi, img_fusion):
    """Pure-JAX reference mirroring the PyTorch module (direct 9-tap conv)."""
    def lap_sq(x):  # x: (N,1,H,W)
        N, C, H, W = x.shape
        xs = x[:, 0].astype(jnp.float32)
        Ho, Wo = H - 2, W - 2
        acc = jnp.zeros((N, Ho, Wo), jnp.float32)
        for di in range(3):
            for dj in range(3):
                acc = acc + jnp.float32(_LAP[di][dj]) * xs[:, di:di + Ho, dj:dj + Wo]
        return (acc * acc)[:, None]

    vi_g = lap_sq(img_vi)
    ir_g = lap_sq(img_ir)
    fu_g = lap_sq(img_fusion)
    s = vi_g + ir_g
    max_g = jnp.round(jnp.floor(s / (jnp.abs(s) + 1e-10))) * jnp.maximum(
        jnp.abs(vi_g), jnp.abs(ir_g))
    grad_loss = jnp.mean(jnp.abs(fu_g - max_g))
    intensity = jnp.mean((img_fusion - img_ir) ** 2) + jnp.mean(
        jnp.abs(img_fusion - img_vi))
    texture = grad_loss
    return intensity + 10.0 * texture, intensity, texture


if __name__ == "__main__":
    key = jax.random.PRNGKey(0)
    k1, k2, k3 = jax.random.split(key, 3)
    N, C, H, W = 2, 1, 16, 16
    img_ir = jax.random.uniform(k1, (N, C, H, W), dtype=jnp.float32)
    img_vi = jax.random.uniform(k2, (N, C, H, W), dtype=jnp.float32)
    img_fusion = jax.random.uniform(k3, (N, C, H, W), dtype=jnp.float32)

    out = g_content_loss(img_ir, img_vi, img_fusion)
    out = jax.block_until_ready(out)

    ref = _reference(img_ir.astype(jnp.float32),
                     img_vi.astype(jnp.float32),
                     img_fusion.astype(jnp.float32))
    for a, b in zip(out, ref):
        assert jnp.allclose(a, b, rtol=1e-5, atol=1e-5), (a, b)

    print("KERNEL_OK")
</pallas_src>

<mosaic_0001>
module attributes {stable_mosaic.version = 11 : i64} {
  func.func @_content_loss_kernel(%arg0: i32, %arg1: memref<2x16x16xf32, #tpu.memory_space<vmem>>, %arg2: memref<2x16x16xf32, #tpu.memory_space<vmem>>, %arg3: memref<2x16x16xf32, #tpu.memory_space<vmem>>, %arg4: memref<1x3x16xf32, #tpu.memory_space<vmem>>) attributes {dimension_semantics = [#tpu.dimension_semantics<parallel>], iteration_bounds = array<i64: 1>, scalar_prefetch = 0 : i64, scratch_operands = 0 : i64, tpu.core_type = #tpu.core_type<tc>, window_params = [{transform_indices = @transform_0, window_bounds = array<i64: 2, 16, 16>}, {transform_indices = @transform_1, window_bounds = array<i64: 2, 16, 16>}, {transform_indices = @transform_2, window_bounds = array<i64: 2, 16, 16>}, {transform_indices = @transform_3, window_bounds = array<i64: 1, 3, 16>}]} {
    %c0 = arith.constant 0 : index
    %c0_0 = arith.constant 0 : index
    %c0_1 = arith.constant 0 : index
    %0 = vector.load %arg1[%c0, %c0_0, %c0_1] : memref<2x16x16xf32, #tpu.memory_space<vmem>>, vector<2x16x16xf32>
    %c0_2 = arith.constant 0 : index
    %c0_3 = arith.constant 0 : index
    %c0_4 = arith.constant 0 : index
    %1 = vector.load %arg2[%c0_2, %c0_3, %c0_4] : memref<2x16x16xf32, #tpu.memory_space<vmem>>, vector<2x16x16xf32>
    %c0_5 = arith.constant 0 : index
    %c0_6 = arith.constant 0 : index
    %c0_7 = arith.constant 0 : index
    %2 = vector.load %arg3[%c0_5, %c0_6, %c0_7] : memref<2x16x16xf32, #tpu.memory_space<vmem>>, vector<2x16x16xf32>
    %3 = vector.extract_strided_slice %0 {offsets = [0, 0, 0], sizes = [2, 14, 16], strides = [1, 1, 1]} : vector<2x16x16xf32> to vector<2x14x16xf32>
    %4 = vector.extract_strided_slice %0 {offsets = [0, 1, 0], sizes = [2, 14, 16], strides = [1, 1, 1]} : vector<2x16x16xf32> to vector<2x14x16xf32>
    %5 = arith.addf %3, %4 : vector<2x14x16xf32>
    %6 = vector.extract_strided_slice %0 {offsets = [0, 2, 0], sizes = [2, 14, 16], strides = [1, 1, 1]} : vector<2x16x16xf32> to vector<2x14x16xf32>
    %7 = arith.addf %5, %6 : vector<2x14x16xf32>
    %8 = vector.extract_strided_slice %7 {offsets = [0, 0, 0], sizes = [2, 14, 14], strides = [1, 1, 1]} : vector<2x14x16xf32> to vector<2x14x14xf32>
    %9 = vector.extract_strided_slice %7 {offsets = [0, 0, 1], sizes = [2, 14, 14], strides = [1, 1, 1]} : vector<2x14x16xf32> to vector<2x14x14xf32>
    %10 = arith.addf %8, %9 : vector<2x14x14xf32>
    %11 = vector.extract_strided_slice %7 {offsets = [0, 0, 2], sizes = [2, 14, 14], strides = [1, 1, 1]} : vector<2x14x16xf32> to vector<2x14x14xf32>
    %12 = arith.addf %10, %11 : vector<2x14x14xf32>
    %13 = vector.extract_strided_slice %0 {offsets = [0, 1, 1], sizes = [2, 14, 14], strides = [1, 1, 1]} : vector<2x16x16xf32> to vector<2x14x14xf32>
    %cst = arith.constant 1.250000e-01 : f32
    %14 = vector.broadcast %cst : f32 to vector<2x14x14xf32>
    %15 = arith.mulf %12, %14 : vector<2x14x14xf32>
    %cst_8 = arith.constant 1.125000e+00 : f32
    %16 = vector.broadcast %cst_8 : f32 to vector<2x14x14xf32>
    %17 = arith.mulf %13, %16 : vector<2x14x14xf32>
    %18 = arith.subf %15, %17 : vector<2x14x14xf32>
    %19 = arith.mulf %18, %18 : vector<2x14x14xf32>
    %20 = vector.extract_strided_slice %1 {offsets = [0, 0, 0], sizes = [2, 14, 16], strides = [1, 1, 1]} : vector<2x16x16xf32> to vector<2x14x16xf32>
    %21 = vector.extract_strided_slice %1 {offsets = [0, 1, 0], sizes = [2, 14, 16], strides = [1, 1, 1]} : vector<2x16x16xf32> to vector<2x14x16xf32>
    %22 = arith.addf %20, %21 : vector<2x14x16xf32>
    %23 = vector.extract_strided_slice %1 {offsets = [0, 2, 0], sizes = [2, 14, 16], strides = [1, 1, 1]} : vector<2x16x16xf32> to vector<2x14x16xf32>
    %24 = arith.addf %22, %23 : vector<2x14x16xf32>
    %25 = vector.extract_strided_slice %24 {offsets = [0, 0, 0], sizes = [2, 14, 14], strides = [1, 1, 1]} : vector<2x14x16xf32> to vector<2x14x14xf32>
    %26 = vector.extract_strided_slice %24 {offsets = [0, 0, 1], sizes = [2, 14, 14], strides = [1, 1, 1]} : vector<2x14x16xf32> to vector<2x14x14xf32>
    %27 = arith.addf %25, %26 : vector<2x14x14xf32>
    %28 = vector.extract_strided_slice %24 {offsets = [0, 0, 2], sizes = [2, 14, 14], strides = [1, 1, 1]} : vector<2x14x16xf32> to vector<2x14x14xf32>
    %29 = arith.addf %27, %28 : vector<2x14x14xf32>
    %30 = vector.extract_strided_slice %1 {offsets = [0, 1, 1], sizes = [2, 14, 14], strides = [1, 1, 1]} : vector<2x16x16xf32> to vector<2x14x14xf32>
    %cst_9 = arith.constant 1.250000e-01 : f32
    %31 = vector.broadcast %cst_9 : f32 to vector<2x14x14xf32>
    %32 = arith.mulf %29, %31 : vector<2x14x14xf32>
    %cst_10 = arith.constant 1.125000e+00 : f32
    %33 = vector.broadcast %cst_10 : f32 to vector<2x14x14xf32>
    %34 = arith.mulf %30, %33 : vector<2x14x14xf32>
    %35 = arith.subf %32, %34 : vector<2x14x14xf32>
    %36 = arith.mulf %35, %35 : vector<2x14x14xf32>
    %37 = vector.extract_strided_slice %2 {offsets = [0, 0, 0], sizes = [2, 14, 16], strides = [1, 1, 1]} : vector<2x16x16xf32> to vector<2x14x16xf32>
    %38 = vector.extract_strided_slice %2 {offsets = [0, 1, 0], sizes = [2, 14, 16], strides = [1, 1, 1]} : vector<2x16x16xf32> to vector<2x14x16xf32>
    %39 = arith.addf %37, %38 : vector<2x14x16xf32>
    %40 = vector.extract_strided_slice %2 {offsets = [0, 2, 0], sizes = [2, 14, 16], strides = [1, 1, 1]} : vector<2x16x16xf32> to vector<2x14x16xf32>
    %41 = arith.addf %39, %40 : vector<2x14x16xf32>
    %42 = vector.extract_strided_slice %41 {offsets = [0, 0, 0], sizes = [2, 14, 14], strides = [1, 1, 1]} : vector<2x14x16xf32> to vector<2x14x14xf32>
    %43 = vector.extract_strided_slice %41 {offsets = [0, 0, 1], sizes = [2, 14, 14], strides = [1, 1, 1]} : vector<2x14x16xf32> to vector<2x14x14xf32>
    %44 = arith.addf %42, %43 : vector<2x14x14xf32>
    %45 = vector.extract_strided_slice %41 {offsets = [0, 0, 2], sizes = [2, 14, 14], strides = [1, 1, 1]} : vector<2x14x16xf32> to vector<2x14x14xf32>
    %46 = arith.addf %44, %45 : vector<2x14x14xf32>
    %47 = vector.extract_strided_slice %2 {offsets = [0, 1, 1], sizes = [2, 14, 14], strides = [1, 1, 1]} : vector<2x16x16xf32> to vector<2x14x14xf32>
    %cst_11 = arith.constant 1.250000e-01 : f32
    %48 = vector.broadcast %cst_11 : f32 to vector<2x14x14xf32>
    %49 = arith.mulf %46, %48 : vector<2x14x14xf32>
    %cst_12 = arith.constant 1.125000e+00 : f32
    %50 = vector.broadcast %cst_12 : f32 to vector<2x14x14xf32>
    %51 = arith.mulf %47, %50 : vector<2x14x14xf32>
    %52 = arith.subf %49, %51 : vector<2x14x14xf32>
    %53 = arith.mulf %52, %52 : vector<2x14x14xf32>
    %54 = arith.addf %36, %19 : vector<2x14x14xf32>
    %55 = math.absf %54 : vector<2x14x14xf32>
    %cst_13 = arith.constant 1.000000e-10 : f32
    %56 = vector.broadcast %cst_13 : f32 to vector<2x14x14xf32>
    %57 = arith.addf %55, %56 : vector<2x14x14xf32>
    %58 = arith.divf %54, %57 : vector<2x14x14xf32>
    %59 = math.floor %58 : vector<2x14x14xf32>
    %60 = math.absf %36 : vector<2x14x14xf32>
    %61 = math.absf %19 : vector<2x14x14xf32>
    %62 = arith.maximumf %60, %61 : vector<2x14x14xf32>
    %63 = arith.mulf %59, %62 : vector<2x14x14xf32>
    %64 = arith.subf %53, %63 : vector<2x14x14xf32>
    %65 = math.absf %64 : vector<2x14x14xf32>
    %66 = arith.subf %2, %0 : vector<2x16x16xf32>
    %cst_14 = arith.constant dense<0.000000e+00> : vector<14xf32>
    %67 = vector.multi_reduction <add>, %65, %cst_14 [0, 1] : vector<2x14x14xf32> to vector<14xf32>
    %68 = vector.shape_cast %67 : vector<14xf32> to vector<1x1x14xf32>
    %c0_15 = arith.constant 0 : index
    %c0_16 = arith.constant 0 : index
    %c0_17 = arith.constant 0 : index
    %69 = vector.load %arg4[%c0_15, %c0_16, %c0_17] : memref<1x3x16xf32, #tpu.memory_space<vmem>>, vector<1x1x14xf32>
    tpu.vector_store %arg4[%c0_15, %c0_16, %c0_17], %68 {strides = array<i32>} : memref<1x3x16xf32, #tpu.memory_space<vmem>>, vector<1x1x14xf32>,
    %cst_18 = arith.constant 0.000000e+00 : f32
    %70 = vector.broadcast %cst_18 : f32 to vector<1x1x2xf32>
    %c0_19 = arith.constant 0 : index
    %c0_20 = arith.constant 0 : index
    %c14 = arith.constant 14 : index
    %71 = vector.load %arg4[%c0_19, %c0_20, %c14] : memref<1x3x16xf32, #tpu.memory_space<vmem>>, vector<1x1x2xf32>
    tpu.vector_store %arg4[%c0_19, %c0_20, %c14], %70 {strides = array<i32>} : memref<1x3x16xf32, #tpu.memory_space<vmem>>, vector<1x1x2xf32>,
    %72 = arith.mulf %66, %66 : vector<2x16x16xf32>
    %cst_21 = arith.constant dense<0.000000e+00> : vector<16xf32>
    %73 = vector.multi_reduction <add>, %72, %cst_21 [0, 1] : vector<2x16x16xf32> to vector<16xf32>
    %74 = vector.shape_cast %73 : vector<16xf32> to vector<1x1x16xf32>
    %c0_22 = arith.constant 0 : index
    %c1 = arith.constant 1 : index
    %c0_23 = arith.constant 0 : index
    %75 = vector.load %arg4[%c0_22, %c1, %c0_23] : memref<1x3x16xf32, #tpu.memory_space<vmem>>, vector<1x1x16xf32>
    tpu.vector_store %arg4[%c0_22, %c1, %c0_23], %74 {strides = array<i32>} : memref<1x3x16xf32, #tpu.memory_space<vmem>>, vector<1x1x16xf32>,
    %76 = arith.subf %2, %1 : vector<2x16x16xf32>
    %77 = math.absf %76 : vector<2x16x16xf32>
    %cst_24 = arith.constant dense<0.000000e+00> : vector<16xf32>
    %78 = vector.multi_reduction <add>, %77, %cst_24 [0, 1] : vector<2x16x16xf32> to vector<16xf32>
    %79 = vector.shape_cast %78 : vector<16xf32> to vector<1x1x16xf32>
    %c0_25 = arith.constant 0 : index
    %c2 = arith.constant 2 : index
    %c0_26 = arith.constant 0 : index
    %80 = vector.load %arg4[%c0_25, %c2, %c0_26] : memref<1x3x16xf32, #tpu.memory_space<vmem>>, vector<1x1x16xf32>
    tpu.vector_store %arg4[%c0_25, %c2, %c0_26], %79 {strides = array<i32>} : memref<1x3x16xf32, #tpu.memory_space<vmem>>, vector<1x1x16xf32>,
    return
  }
  func.func @transform_0(%arg0: i32) -> (i32, i32, i32) {
    %c0_i32 = arith.constant 0 : i32
    %c0_i32_0 = arith.constant 0 : i32
    %c0_i32_1 = arith.constant 0 : i32
    return %arg0, %c0_i32, %c0_i32_0 : i32, i32, i32
  }
  func.func @transform_1(%arg0: i32) -> (i32, i32, i32) {
    %c0_i32 = arith.constant 0 : i32
    %c0_i32_0 = arith.constant 0 : i32
    %c0_i32_1 = arith.constant 0 : i32
    return %arg0, %c0_i32, %c0_i32_0 : i32, i32, i32
  }
  func.func @transform_2(%arg0: i32) -> (i32, i32, i32) {
    %c0_i32 = arith.constant 0 : i32
    %c0_i32_0 = arith.constant 0 : i32
    %c0_i32_1 = arith.constant 0 : i32
    return %arg0, %c0_i32, %c0_i32_0 : i32, i32, i32
  }
  func.func @transform_3(%arg0: i32) -> (i32, i32, i32) {
    %c0_i32 = arith.constant 0 : i32
    %c0_i32_0 = arith.constant 0 : i32
    %c0_i32_1 = arith.constant 0 : i32
    return %arg0, %c0_i32, %c0_i32_0 : i32, i32, i32
  }
}

</mosaic_0001>

<bundles_post_ra>
// kernel: g_content_loss.1
= control target key start
LH: loop header
LB: loop body
LE: loop exit
PB: predicated region body
PF: predicated region fallthrough
CT: control target
= control target key end

     0   :  { %8 = vsyncpa [#allocation3], 0  ;;  %s869_s0 = inlined_call_operand.hbm [shape: f32[2,16,16], index: 0, kind: input, shape index: {}]   ;;  %s870_s1 = inlined_call_operand.hbm [shape: f32[2,16,16], index: 1, kind: input, shape index: {}]   ;;  %s871_s2 = inlined_call_operand.hbm [shape: f32[2,16,16], index: 2, kind: input, shape index: {}]   ;;  %s872_s3 = inlined_call_operand.vmem [shape: f32[1,3,16], index: 3, kind: output, shape index: {}]  }
   0x1   :  { %9 = vsyncpa [#allocation5], 0  ;;  %s586_s12 = smov [#allocation4]   ;;  %s587_s14 = smov [#allocation2]  }
   0x2   :  { %s27_s13 = sshll.u32 %s586_s12, 4  ;;  %s15_s15 = sshll.u32 %s587_s14, 4  ;;  %s28_s13 = int_to_ptr.vmem [resolvable:$true] %s27_s13  ;;  %s16_s15 = int_to_ptr.vmem [resolvable:$true] %s15_s15 }
   0x3   :  { %s530_s16 = scalar_lea.vmem %s28_s13, 512  ;;  %p535_p1 = scmp.lt.s32.totalorder %s28_s13, %s28_s13 }
   0x4   :  { %p531_p0 = scmp.ne.s32.totalorder %s28_s13, %s530_s16  ;;  %p536_p2 = scmp.lt.s32.totalorder %s530_s16, %s530_s16 }
   0x6   :  { %p537_p3 = por %p536_p2, %p535_p1 }
   0x8   :  { %p538_p4 = pnand %p537_p3, %p531_p0 }
   0xa   :  { %541 = shalt.err (!%p538_p4)
}
   0xb   :  { %s588_s17 = smov 128   ;;  %s589_s18 = smov 8  }
   0xc   :  { %33 = dma.hbm_to_vmem [thread:$0]  %s870_s1, 512, %s28_s13, [#allocation5], %s588_s17, %s588_s17, %s589_s18  }
   0xd   :  { %s550_s21 = scalar_lea.vmem %s16_s15, 512  ;;  %p555_p6 = scmp.lt.s32.totalorder %s16_s15, %s16_s15 }
   0xe   :  { %p551_p5 = scmp.ne.s32.totalorder %s16_s15, %s550_s21  ;;  %p556_p7 = scmp.lt.s32.totalorder %s550_s21, %s550_s21 }
  0x10   :  { %p557_p8 = por %p556_p7, %p555_p6 }
  0x12   :  { %p558_p9 = pnand %p557_p8, %p551_p5 }
  0x14   :  { %561 = shalt.err (!%p558_p9)
}
  0x15   :  { %21 = dma.hbm_to_vmem [thread:$0]  %s869_s0, 512, %s16_s15, [#allocation3], %s588_s17, %s588_s17, %s589_s18  }
  0x16   :  { %s590_s24 = smov [#allocation6]  }
  0x17   :  { %s39_s25 = sshll.u32 %s590_s24, 4  ;;  %s40_s25 = int_to_ptr.vmem [resolvable:$true] %s39_s25 }
  0x18   :  { %s570_s26 = scalar_lea.vmem %s40_s25, 512  ;;  %p575_p11 = scmp.lt.s32.totalorder %s40_s25, %s40_s25 }
  0x19   :  { %p571_p10 = scmp.ne.s32.totalorder %s40_s25, %s570_s26  ;;  %p576_p12 = scmp.lt.s32.totalorder %s570_s26, %s570_s26 }
  0x1b   :  { %p577_p13 = por %p576_p12, %p575_p11 }
  0x1d   :  { %p578_p0 = pnand %p577_p13, %p571_p10 }
  0x1f   :  { %581 = shalt.err (!%p578_p0)
}
  0x20   :  { %45 = dma.hbm_to_vmem [thread:$0]  %s871_s2, 512, %s40_s25, [#allocation5], %s588_s17, %s588_s17, %s589_s18  }
  0x21   :  { %582 = dma.done.wait [#allocation3], 512  }
  0x22   :  { %583 = vsyncadd [#allocation3], 4294966784 }
  0x23   :  { %584 = dma.done.wait [#allocation5], 1024  }
  0x24   :  { %585 = vsyncadd [#allocation5], 4294966272  ;;  %v623_v0 = vld [vmem:[#allocation4 + $0x8] sm:$0xff]  ;;  %v627_v2 = vld [vmem:[#allocation4] sm:$0xff]  ;;  %vm71_vm0 = vcmask 1046528   ;;  %vm86_vm1 = vcmask 1045504  }
  0x25   :  { %v625_v1 = vld [vmem:[#allocation2 + $0x8] sm:$0xff]  ;;  %v180_v3 = vrot.slane %v623_v0, 1  ;;  %v194_v4 = vrot.slane %v623_v0, 2  ;;  %v633_v7 = vld [vmem:[#allocation2] sm:$0xff]  ;;  %v635_v8 = vld [vmem:[#allocation4 + $0x10] sm:$0xff]  ;;  %v179_v9 = vrot.slane %v627_v2, 1 }
  0x26   :  { %v73_v5 = vrot.slane %v625_v1, 1  ;;  %v88_v6 = vrot.slane %v625_v1, 2  ;;  %v193_v10 = vrot.slane %v627_v2, 2  ;;  %v72_v11 = vrot.slane %v633_v7, 1  ;;  %v641_v13 = vld [vmem:[#allocation4 + $0x18] sm:$0xff]  ;;  %v647_v18 = vld [vmem:[#allocation2 + $0x10] sm:$0xff] }
  0x27   :  { %v87_v12 = vrot.slane %v633_v7, 2  ;;  %v190_v14 = vadd.f32 %v180_v3, %v623_v0  ;;  %v182_v16 = vrot.slane %v635_v8, 1  ;;  %v183_v17 = vrot.slane %v641_v13, 1  ;;  %v652_v22 = vld [vmem:[#allocation2 + $0x18] sm:$0xff]  ;;  %s591_s0 = smov 127   ;;  %s592_s2 = smov 126  }
  0x28   :  { %v83_v15 = vadd.f32 %v73_v5, %v625_v1  ;;  %v181_v19 = vsel %vm71_vm0, %v179_v9, %v180_v3  ;;  %v195_v20 = vsel %vm86_vm1, %v193_v10, %v194_v4  ;;  %v74_v21 = vsel %vm71_vm0, %v72_v11, %v73_v5  ;;  %v693_v44 = vld [vmem:[#allocation6 + $0x8] sm:$0xff]  ;;  %v699_v47 = vld [vmem:[#allocation6] sm:$0xff]  ;;  %v712_v57 = vld [vmem:[#allocation6 + $0x10] sm:$0xff] }
  0x29   :  { %v654_v23 = vadd.f32 %v194_v4, %v190_v14  ;;  %v189_v25 = vadd.f32 %v181_v19, %v627_v2  ;;  %v89_v26 = vsel %vm86_vm1, %v87_v12, %v88_v6  ;;  %v75_v27 = vrot.slane %v647_v18, 1  ;;  %v726_v4 = vld [vmem:[#allocation6 + $0x18] sm:$0xff] }
  0x2a   :  { %v656_v24 = vadd.f32 %v88_v6, %v83_v15  ;;  %v82_v29 = vadd.f32 %v74_v21, %v633_v7  ;;  %v184_v30 = vsel %vm71_vm0, %v182_v16, %v183_v17  ;;  %v76_v31 = vrot.slane %v652_v22, 1 }
  0x2b   :  { %213 = vrot.lane.b32.xlu1 %v654_v23, %s591_s0  ;;  %v665_v28 = vadd.f32 %v195_v20, %v189_v25  ;;  %v196_v32 = vrot.slane %v635_v8, 2  ;;  %v197_v33 = vrot.slane %v641_v13, 2  ;;  %v90_v34 = vrot.slane %v647_v18, 2 }
  0x2c   :  { %107 = vrot.lane.b32.xlu0 %v656_v24, %s591_s0  ;;  %v91_v35 = vrot.slane %v652_v22, 2  ;;  %v77_v36 = vsel %vm71_vm0, %v75_v27, %v76_v31  ;;  %v679_v37 = vadd.f32 %v89_v26, %v82_v29  ;;  %v191_v38 = vadd.f32 %v184_v30, %v635_v8 }
  0x2d   :  { %v84_v39 = vadd.f32 %v77_v36, %v647_v18  ;;  %v198_v40 = vsel %vm86_vm1, %v196_v32, %v197_v33  ;;  %v436_v45 = vsub.f32 %v693_v44, %v625_v1  ;;  %v479_v46 = vsub.f32 %v693_v44, %v623_v0 }
  0x2e   :  { %v92_v41 = vsel %vm86_vm1, %v90_v34, %v91_v35  ;;  %v689_v42 = vadd.f32 %v198_v40, %v191_v38  ;;  %vm462_vm2 = vcmask 130048   ;;  %v435_v48 = vsub.f32 %v699_v47, %v633_v7 }
  0x2f   :  { %211 = vrot.lane.b32.xlu1 %v665_v28, %s591_s0  ;;  %v691_v43 = vadd.f32 %v92_v41, %v84_v39  ;;  %v459_v49 = vmul.f32 %v436_v45, %v436_v45  ;;  %v483_v50 = vand.u32 2147483647, %v479_v46  ;;  %v478_v51 = vsub.f32 %v699_v47, %v627_v2 }
  0x30   :  { %123 = vrot.lane.b32.xlu0 %v656_v24, %s592_s2  ;;  %v85_v52 = vadd.f32 %v76_v31, %v652_v22  ;;  %v458_v53 = vmul.f32 %v435_v48, %v435_v48  ;;  %v437_v60 = vsub.f32 %v712_v57, %v647_v18  ;;  %v192_v62 = vadd.f32 %v183_v17, %v641_v13 }
  0x31   :  { %v464_v54 = vsel %vm462_vm2, %v459_v49, 0.0  ;;  %v482_v55 = vand.u32 2147483647, %v478_v51  ;;  %v487_v58 = vsel %vm462_vm2, %v483_v50, 0.0  ;;  %v141_v63 = vmul.f32 1.125, %v633_v7 }
  0x32   :  { %v463_v56 = vsel %vm462_vm2, %v458_v53, 0.0  ;;  %v722_v61 = vadd.f32 %v91_v35, %v85_v52  ;;  %v142_v5 = vmul.f32 1.125, %v625_v1  ;;  %v438_v6 = vsub.f32 %v726_v4, %v652_v22 }
  0x33   :  { %121 = vrot.lane.b32.xlu1 %v679_v37, %s592_s2  ;;  %v486_v59 = vsel %vm462_vm2, %v482_v55, 0.0  ;;  %v465_v3 = vadd.f32 %v464_v54, %v463_v56  ;;  %v460_v9 = vmul.f32 %v437_v60, %v437_v60  ;;  %v480_v10 = vsub.f32 %v712_v57, %v635_v8 }
  0x34   :  { %105 = vrot.lane.b32.xlu0 %v679_v37, %s591_s0  ;;  %v488_v11 = vadd.f32 %v487_v58, %v486_v59  ;;  %v481_v12 = vsub.f32 %v726_v4, %v641_v13  ;;  %v461_v14 = vmul.f32 %v438_v6, %v438_v6  ;;  %v740_v1 = vadd.f32 %v197_v33, %v192_v62 }
  0x35   :  { %v466_v15 = vsel %vm462_vm2, %v460_v9, 0.0  ;;  %v484_v7 = vand.u32 2147483647, %v480_v10  ;;  %v149_v19 = vrot.slane %v141_v63, 1  ;;  %v150_v20 = vrot.slane %v142_v5, 1 }
  0x36   :  { %v467_v16 = vadd.f32 %v466_v15, %v465_v3  ;;  %v485_v17 = vand.u32 2147483647, %v481_v12  ;;  %v468_v21 = vsel %vm462_vm2, %v461_v14, 0.0  ;;  %v248_v33 = vmul.f32 1.125, %v623_v0 }
  0x37   :  { %215 = vrot.lane.b32.xlu1 %v689_v42, %s591_s0  ;;  %v489_v25 = vsel %vm462_vm2, %v484_v7, 0.0  ;;  %v151_v32 = vsel %vm71_vm0, %v149_v19, %v150_v20  ;;  %v247_v34 = vmul.f32 1.125, %v627_v2  ;;  %v249_v38 = vmul.f32 1.125, %v635_v8 }
  0x38   :  { %109 = vrot.lane.b32.xlu0 %v691_v43, %s591_s0  ;;  %v469_v26 = vadd.f32 %v468_v21, %v467_v16  ;;  %v490_v27 = vadd.f32 %v489_v25, %v488_v11  ;;  %v491_v29 = vsel %vm462_vm2, %v485_v17, 0.0  ;;  %v250_v39 = vmul.f32 1.125, %v641_v13 }
  0x39   :  { %v143_v40 = vmul.f32 1.125, %v647_v18  ;;  %v144_v41 = vmul.f32 1.125, %v652_v22  ;;  %v256_v0 = vrot.slane %v248_v33, 1  ;;  %v255_v48 = vrot.slane %v247_v34, 1 }
  0x3a   :  { %v470_v30 = vrot.slane %v469_v26, 4  ;;  %v492_v31 = vadd.f32 %v491_v29, %v490_v27  ;;  %v258_v50 = vrot.slane %v249_v38, 1  ;;  %v259_v51 = vrot.slane %v250_v39, 1 }
  0x3b   :  { %229 = vrot.lane.b32.xlu1 %v654_v23, %s592_s2  ;;  %v152_v8 = vrot.slane %v143_v40, 1  ;;  %v153_v13 = vrot.slane %v144_v41, 1  ;;  %v257_v18 = vsel %vm71_vm0, %v255_v48, %v256_v0  ;;  %v286_v22 = vrot.slane %v693_v44, 1 }
  0x3c   :  { %227 = vrot.lane.b32.xlu0 %v665_v28, %s592_s2  ;;  %v471_v35 = vadd.f32 %v470_v30, %v469_v26  ;;  %v493_v36 = vrot.slane %v492_v31, 4  ;;  %v285_v54 = vrot.slane %v699_v47, 1  ;;  %vm476_vm3 = vcmask 122880  }
  0x3d   :  { %v260_v58 = vsel %vm71_vm0, %v258_v50, %v259_v51  ;;  %v154_v59 = vsel %vm71_vm0, %v152_v8, %v153_v13  ;;  %v300_v60 = vrot.slane %v693_v44, 2  ;;  %v299_v3 = vrot.slane %v699_v47, 2 }
  0x3e   :  { %v472_v45 = vrot.slane %v471_v35, 2  ;;  %v494_v46 = vadd.f32 %v493_v36, %v492_v31  ;;  %v287_v63 = vsel %vm71_vm0, %v285_v54, %v286_v22  ;;  %v288_v5 = vrot.slane %v712_v57, 1 }
  0x3f   :  { %125 = vrot.lane.b32.xlu1 %v691_v43, %s592_s2  ;;  %v289_v6 = vrot.slane %v726_v4, 1  ;;  %v296_v9 = vadd.f32 %v286_v22, %v693_v44  ;;  %v295_v10 = vadd.f32 %v287_v63, %v699_v47  ;;  %v301_v11 = vsel %vm86_vm1, %v299_v3, %v300_v60 }
  0x40   :  { %111 = vrot.lane.b32.xlu0 %v722_v61, %s591_s0  ;;  %v473_v2 = vadd.f32 %v472_v45, %v471_v35  ;;  %v495_v49 = vrot.slane %v494_v46, 2  ;;  %v302_v14 = vrot.slane %v712_v57, 2  ;;  %v303_v15 = vrot.slane %v726_v4, 2 }
  0x41   :  { %v290_v12 = vsel %vm71_vm0, %v288_v5, %v289_v6  ;;  %v790_v7 = vadd.f32 %v300_v60, %v296_v9  ;;  %v792_v16 = vadd.f32 %v301_v11, %v295_v10  ;;  %v298_v21 = vadd.f32 %v289_v6, %v726_v4 }
  0x42   :  { %v474_v52 = vrot.slane %v473_v2, 1  ;;  %v496_v53 = vadd.f32 %v495_v49, %v494_v46  ;;  %v297_v17 = vadd.f32 %v290_v12, %v712_v57  ;;  %v304_v19 = vsel %vm86_vm1, %v302_v14, %v303_v15 }
  0x43   :  { %231 = vrot.lane.b32.xlu1 %v689_v42, %s592_s2  ;;  %v807_v25 = vadd.f32 %v303_v15, %v298_v21  ;;  %v354_v26 = vmul.f32 1.125, %v693_v44  ;;  %v353_v27 = vmul.f32 1.125, %v699_v47  ;;  %v356_v31 = vmul.f32 1.125, %v726_v4 }
  0x44   :  { %217 = vrot.lane.b32.xlu0 %v740_v1, %s591_s0  ;;  %v475_v55 = vadd.f32 %v474_v52, %v473_v2  ;;  %v497_v56 = vrot.slane %v496_v53, 1  ;;  %vm441_vm4 = vcmask 111616   ;;  %vm439_vm5 = vcmask 113664  }
  0x45   :  { %v362_v29 = vrot.slane %v354_v26, 1  ;;  %v361_v30 = vrot.slane %v353_v27, 1  ;;  %v365_v47 = vrot.slane %v356_v31, 1  ;;  %vm454_vm6 = vcmask 106496  }
  0x46   :  { %477 = vst.msk [vmem:[%s872_s3 + $0x1] sm:$0x1] %vm476_vm3, %v475_v55  ;;  %v498_v62 = vadd.f32 %v497_v56, %v496_v53  ;;  %vm456_vm7 = vcmask 122992  }
  0x47   :  { %155 = vrot.lane.b32.xlu1 %v151_v32, %s591_s0  ;;  %v355_v32 = vmul.f32 1.125, %v712_v57  ;;  %v363_v44 = vsel %vm71_vm0, %v361_v30, %v362_v29 }
  0x48   :  { %127 = vrot.lane.b32.xlu0 %v722_v61, %s592_s2  ;;  %499 = vst.msk [vmem:[%s872_s3 + $0x2] sm:$0x1] %vm476_vm3, %v498_v62 }
  0x49   :  { %v364_v33 = vrot.slane %v355_v32, 1 }
  0x4b   :  { %233 = vrot.lane.b32.xlu1 %v740_v1, %s592_s2  ;;  %v366_v34 = vsel %vm71_vm0, %v364_v33, %v365_v47 }
  0x4c   :  { %157 = vrot.lane.b32.xlu0 %v150_v20, %s591_s0  ;;  %v800_v20 = vadd.f32 %v304_v19, %v297_v17 }
  0x4f   :  { %263 = vrot.lane.b32.xlu1 %v256_v0, %s591_s0 }
  0x50   :  { %261 = vrot.lane.b32.xlu0 %v257_v18, %s591_s0 }
  0x53   :  { %265 = vrot.lane.b32.xlu1 %v260_v58, %s591_s0 }
  0x54   :  { %159 = vrot.lane.b32.xlu0 %v154_v59, %s591_s0 }
  0x57   :  { %267 = vrot.lane.b32.xlu1 %v259_v51, %s591_s0 }
  0x58   :  { %161 = vrot.lane.b32.xlu0 %v153_v13, %s591_s0 }
  0x5b   :  { %319 = vrot.lane.b32.xlu1 %v790_v7, %s591_s0 }
  0x5c   :  { %317 = vrot.lane.b32.xlu0 %v792_v16, %s591_s0 }
  0x5f   :  { %333 = vrot.lane.b32.xlu1 %v792_v16, %s592_s2 }
  0x60   :  { %321 = vrot.lane.b32.xlu0 %v800_v20, %s591_s0 }
  0x63   :  { %323 = vrot.lane.b32.xlu1 %v807_v25, %s591_s0 }
  0x64   :  { %335 = vrot.lane.b32.xlu0 %v790_v7, %s592_s2 }
  0x67   :  { %339 = vrot.lane.b32.xlu1 %v807_v25, %s592_s2 }
  0x68   :  { %337 = vrot.lane.b32.xlu0 %v800_v20, %s592_s2 }
  0x6b   :  { %369 = vrot.lane.b32.xlu1 %v362_v29, %s591_s0 }
  0x6c   :  { %367 = vrot.lane.b32.xlu0 %v363_v44, %s591_s0 }
  0x6f   :  { %373 = vrot.lane.b32.xlu1 %v365_v47, %s591_s0 }
  0x70   :  { %371 = vrot.lane.b32.xlu0 %v366_v34, %s591_s0 }
  0x9d   :  { %v214_v57 = vpop.permute.xlu1 %213 }
  0x9e   :  { %v108_v4 = vpop.permute.xlu0 %107  ;;  %v224_v53 = vadd.f32 %v214_v57, %v654_v23 }
  0x9f   :  { %v118_v51 = vadd.f32 %v108_v4, %v656_v24 }
  0xa1   :  { %v212_v35 = vpop.permute.xlu1 %211 }
  0xa2   :  { %v124_v36 = vpop.permute.xlu0 %123  ;;  %v223_v18 = vadd.f32 %v212_v35, %v665_v28 }
  0xa3   :  { %v134_v22 = vadd.f32 %v124_v36, %v118_v51 }
  0xa5   :  { %v122_v38 = vpop.permute.xlu1 %121  ;;  %v138_v60 = vmul.f32 0.125, %v134_v22 }
  0xa6   :  { %v106_v39 = vpop.permute.xlu0 %105 }
  0xa7   :  { %v117_v2 = vadd.f32 %v106_v39, %v679_v37 }
  0xa9   :  { %v216_v40 = vpop.permute.xlu1 %215  ;;  %v133_v8 = vadd.f32 %v122_v38, %v117_v2 }
  0xaa   :  { %v110_v41 = vpop.permute.xlu0 %109  ;;  %v225_v37 = vadd.f32 %v216_v40, %v689_v42 }
  0xab   :  { %v137_v56 = vmul.f32 0.125, %v133_v8  ;;  %v119_v62 = vadd.f32 %v110_v41, %v691_v43 }
  0xad   :  { %v230_v45 = vpop.permute.xlu1 %229 }
  0xae   :  { %v228_v46 = vpop.permute.xlu0 %227  ;;  %v240_v54 = vadd.f32 %v230_v45, %v224_v53 }
  0xaf   :  { %v239_v55 = vadd.f32 %v228_v46, %v223_v18 }
  0xb0   :  { %v244_v24 = vmul.f32 0.125, %v240_v54 }
  0xb1   :  { %v126_v0 = vpop.permute.xlu1 %125  ;;  %v243_v3 = vmul.f32 0.125, %v239_v55 }
  0xb2   :  { %v112_v48 = vpop.permute.xlu0 %111  ;;  %v135_v6 = vadd.f32 %v126_v0, %v119_v62 }
  0xb3   :  { %v120_v23 = vadd.f32 %v112_v48, %v722_v61 }
  0xb4   :  { %v139_v26 = vmul.f32 0.125, %v135_v6 }
  0xb5   :  { %v232_v49 = vpop.permute.xlu1 %231 }
  0xb6   :  { %v218_v50 = vpop.permute.xlu0 %217  ;;  %v241_v9 = vadd.f32 %v232_v49, %v225_v37 }
  0xb7   :  { %v226_v11 = vadd.f32 %v218_v50, %v740_v1 }
  0xb8   :  { %v245_v27 = vmul.f32 0.125, %v241_v9 }
  0xb9   :  { %v156_v13 = vpop.permute.xlu1 %155 }
  0xba   :  { %v128_v52 = vpop.permute.xlu0 %127  ;;  %v167_v63 = vsub.f32 %v137_v56, %v156_v13 }
  0xbb   :  { %v136_v17 = vadd.f32 %v128_v52, %v120_v23 }
  0xbc   :  { %v835_v15 = vmul.f32 %v167_v63, %v167_v63 }
  0xbd   :  { %v234_v58 = vpop.permute.xlu1 %233  ;;  %v140_v47 = vmul.f32 0.125, %v136_v17 }
  0xbe   :  { %v158_v59 = vpop.permute.xlu0 %157  ;;  %v242_v42 = vadd.f32 %v234_v58, %v226_v11 }
  0xbf   :  { %v168_v5 = vsub.f32 %v138_v60, %v158_v59 }
  0xc0   :  { %v246_v1 = vmul.f32 0.125, %v242_v42 }
  0xc1   :  { %v264_v28 = vpop.permute.xlu1 %263  ;;  %v172_v19 = vmul.f32 %v168_v5, %v168_v5  ;;  %v415_v5 = vand.u32 2147483647, %v835_v15 }
  0xc2   :  { %v262_v10 = vpop.permute.xlu0 %261  ;;  %v274_v12 = vsub.f32 %v244_v24, %v264_v28 }
  0xc3   :  { %v273_v14 = vsub.f32 %v243_v3, %v262_v10  ;;  %v416_v23 = vand.u32 2147483647, %v172_v19 }
  0xc4   :  { %v278_v43 = vmul.f32 %v274_v12, %v274_v12 }
  0xc5   :  { %v277_v21 = vmul.f32 %v273_v14, %v273_v14  ;;  %v266_v29 = vpop.permute.xlu1 %265 }
  0xc6   :  { %v160_v30 = vpop.permute.xlu0 %159  ;;  %v388_v31 = vadd.f32 %v278_v43, %v172_v19  ;;  %v275_v32 = vsub.f32 %v245_v27, %v266_v29  ;;  %v412_v37 = vand.u32 2147483647, %v278_v43 }
  0xc7   :  { %v387_v61 = vadd.f32 %v277_v21, %v835_v15  ;;  %v169_v44 = vsub.f32 %v139_v26, %v160_v30  ;;  %v411_v62 = vand.u32 2147483647, %v277_v21 }
  0xc8   :  { %v392_v33 = vand.u32 2147483647, %v388_v31  ;;  %v838_v57 = vmul.f32 %v275_v32, %v275_v32 }
  0xc9   :  { %v391_v34 = vand.u32 2147483647, %v387_v61  ;;  %v840_v4 = vmul.f32 %v169_v44, %v169_v44  ;;  %v268_v35 = vpop.permute.xlu1 %267  ;;  %v419_v14 = vmax.f32.f32 %v411_v62, %v415_v5  ;;  %v593_v5 = vmov 0.0  }
  0xca   :  { %v162_v36 = vpop.permute.xlu0 %161  ;;  %v396_v38 = vadd.f32 1e-10, %v392_v33  ;;  %v276_v40 = vsub.f32 %v246_v1, %v268_v35  ;;  %v413_v26 = vand.u32 2147483647, %v838_v57 }
  0xcb   :  { %v395_v39 = vadd.f32 1e-10, %v391_v34  ;;  %v170_v41 = vsub.f32 %v140_v47, %v162_v36  ;;  %v389_v45 = vadd.f32 %v838_v57, %v840_v4  ;;  %v417_v15 = vand.u32 2147483647, %v840_v4 }
  0xcc   :  { %514 = vrcp.f32 %v396_v38  ;;  %v844_v46 = vmul.f32 %v276_v40, %v276_v40 }
  0xcd   :  { %v846_v0 = vmul.f32 %v170_v41, %v170_v41  ;;  %516 = vrcp.f32 %v395_v39  ;;  %v393_v48 = vand.u32 2147483647, %v389_v45  ;;  %v320_v2 = vpop.permute.xlu1 %319  ;;  %v421_v40 = vmax.f32.f32 %v413_v26, %v417_v15 }
  0xce   :  { %v318_v49 = vpop.permute.xlu0 %317  ;;  %v330_v54 = vadd.f32 %v320_v2, %v790_v7 }
  0xcf   :  { %v390_v50 = vadd.f32 %v844_v46, %v846_v0  ;;  %v397_v51 = vadd.f32 1e-10, %v393_v48  ;;  %v329_v55 = vadd.f32 %v318_v49, %v792_v16  ;;  %v418_v30 = vand.u32 2147483647, %v846_v0 }
  0xd1   :  { %v394_v8 = vand.u32 2147483647, %v390_v50  ;;  %518 = vrcp.f32 %v397_v51  ;;  %v334_v13 = vpop.permute.xlu1 %333 }
  0xd2   :  { %v322_v52 = vpop.permute.xlu0 %321  ;;  %v345_v58 = vadd.f32 %v334_v13, %v329_v55 }
  0xd3   :  { %v398_v53 = vadd.f32 1e-10, %v394_v8  ;;  %v331_v28 = vadd.f32 %v322_v52, %v800_v20  ;;  %v414_v20 = vand.u32 2147483647, %v844_v46 }
  0xd4   :  { %v349_v16 = vmul.f32 0.125, %v345_v58 }
  0xd5   :  { %520 = vrcp.f32 %v398_v53  ;;  %v324_v18 = vpop.permute.xlu1 %323  ;;  %v422_v46 = vmax.f32.f32 %v414_v20, %v418_v30 }
  0xd6   :  { %v336_v22 = vpop.permute.xlu0 %335  ;;  %v332_v56 = vadd.f32 %v324_v18, %v807_v25  ;;  %v420_v25 = vmax.f32.f32 %v412_v37, %v416_v23 }
  0xd7   :  { %v346_v59 = vadd.f32 %v336_v22, %v330_v54 }
  0xd9   :  { %v515_v60 = vpop.eup %514  ;;  %v340_v63 = vpop.permute.xlu1 %339  ;;  %v350_v11 = vmul.f32 0.125, %v346_v59 }
  0xda   :  { %v338_v24 = vpop.permute.xlu0 %337  ;;  %v517_v3 = vpop.eup %516  ;;  %v402_v6 = vmul.f32 %v515_v60, %v388_v31  ;;  %v348_v7 = vadd.f32 %v340_v63, %v332_v56 }
  0xdb   :  { %v400_v9 = vmul.f32 %v517_v3, %v387_v61  ;;  %v347_v17 = vadd.f32 %v338_v24, %v331_v28 }
  0xdc   :  { %v408_v10 = vfloor.f32 %v402_v6  ;;  %v352_v31 = vmul.f32 0.125, %v348_v7 }
  0xdd   :  { %v407_v12 = vfloor.f32 %v400_v9  ;;  %v370_v42 = vpop.permute.xlu1 %369  ;;  %v351_v34 = vmul.f32 0.125, %v347_v17 }
  0xde   :  { %v368_v43 = vpop.permute.xlu0 %367  ;;  %v519_v21 = vpop.eup %518  ;;  %v380_v27 = vsub.f32 %v350_v11, %v370_v42  ;;  %v424_v32 = vmul.f32 %v420_v25, %v408_v10 }
  0xdf   :  { %v379_v19 = vsub.f32 %v349_v16, %v368_v43  ;;  %v404_v29 = vmul.f32 %v519_v21, %v389_v45  ;;  %v423_v44 = vmul.f32 %v419_v14, %v407_v12 }
  0xe0   :  { %v384_v61 = vmul.f32 %v380_v27, %v380_v27 }
  0xe1   :  { %v383_v47 = vmul.f32 %v379_v19, %v379_v19  ;;  %v409_v33 = vfloor.f32 %v404_v29  ;;  %v374_v35 = vpop.permute.xlu1 %373 }
  0xe2   :  { %v521_v1 = vpop.eup %520  ;;  %v372_v36 = vpop.permute.xlu0 %371  ;;  %v428_v38 = vsub.f32 %v384_v61, %v424_v32  ;;  %v382_v39 = vsub.f32 %v352_v31, %v374_v35 }
  0xe3   :  { %v406_v57 = vmul.f32 %v521_v1, %v390_v50  ;;  %v427_v4 = vsub.f32 %v383_v47, %v423_v44  ;;  %v381_v41 = vsub.f32 %v351_v34, %v372_v36  ;;  %v425_v2 = vmul.f32 %v421_v40, %v409_v33 }
  0xe4   :  { %v432_v0 = vand.u32 2147483647, %v428_v38  ;;  %v386_v51 = vmul.f32 %v382_v39, %v382_v39 }
  0xe5   :  { %v410_v45 = vfloor.f32 %v406_v57  ;;  %v431_v48 = vand.u32 2147483647, %v427_v4  ;;  %v385_v49 = vmul.f32 %v381_v41, %v381_v41 }
  0xe6   :  { %v442_v13 = vsel %vm441_vm4, %v432_v0, 0.0 }
  0xe7   :  { %v426_v8 = vmul.f32 %v422_v46, %v410_v45  ;;  %v440_v52 = vsel %vm439_vm5, %v431_v48, 0.0  ;;  %v429_v50 = vsub.f32 %v385_v49, %v425_v2 }
  0xe8   :  { %v443_v22 = vadd.f32 %v442_v13, %v440_v52 }
  0xe9   :  { %v430_v53 = vsub.f32 %v386_v51, %v426_v8  ;;  %v433_v18 = vand.u32 2147483647, %v429_v50 }
  0xeb   :  { %v434_v54 = vand.u32 2147483647, %v430_v53  ;;  %v444_v55 = vsel %vm439_vm5, %v433_v18, 0.0 }
  0xec   :  { %v445_v58 = vadd.f32 %v444_v55, %v443_v22 }
  0xed   :  { %v446_v56 = vsel %vm441_vm4, %v434_v54, 0.0 }
  0xee   :  { %v447_v59 = vadd.f32 %v446_v56, %v445_v58 }
  0xf0   :  { %v448_v60 = vrot.slane %v447_v59, 4 }
  0xf2   :  { %v449_v37 = vadd.f32 %v448_v60, %v447_v59 }
  0xf4   :  { %v450_v62 = vrot.slane %v449_v37, 2 }
  0xf6   :  { %v451_v63 = vadd.f32 %v450_v62, %v449_v37 }
  0xf8   :  { %v452_v24 = vrot.slane %v451_v63, 1 }
  0xfa   :  { %v453_v3 = vadd.f32 %v452_v24, %v451_v63 }
  0xfc   :  { %455 = vst.msk [vmem:[%s872_s3] sm:$0x1] %vm454_vm6, %v453_v3 }
  0xfd   :  { %457 = vst.msk [vmem:[%s872_s3] sm:$0x1] %vm456_vm7, %v593_v5 }
  0xfe   :  { %504 = vsyncpa [#allocation3], 1 }
  0xff   :  { %505 = vsyncpa [#allocation5], 1 }

</bundles_post_ra>
